<compile_context>
chip_gen: v6e
topology: v6e:2x2x1
jax: 0.10.0
libtpu: 0.0.40
codegen_flags: <defaults>
</compile_context>

<pallas_src>
import functools

import jax
import jax.numpy as jnp
from jax.experimental import pallas as pl
from jax.experimental.pallas import tpu as pltpu


def _translate_mlp_kernel(
    x_ref,        # [tile_m, 2F]  bf16 (batch on sublanes only for the HBM-side layout)
    wxT_ref,      # [64, 2F]      bf16 (packed W1|W2x|W3x|W4x, PyTorch [out,in] layout)
    bxT_ref,      # [64, 1]       f32  (packed b1|b2|b3|b4)
    w2hT_ref,     # [16, 32]      f32
    w3hT_ref,     # [ 8, 16]      f32
    w4hT_ref,     # [ 8,  8]      f32
    whT_ref,      # [ 2,  8]      f32  (row 0 = tsdf head, row 1 = occupancy head)
    bhT_ref,      # [ 2,  1]      f32
    out_ref,      # [ 2, tile_m]  f32  (row 0 = tsdf, row 1 = occupancy) -- lane-dense
    *, tsdf_scale, out_channels,
):
    f32 = jnp.float32
    c1, c2, c3, _ = out_channels
    o2, o3, o4 = c1, c1 + c2, c1 + c2 + c3        # 32, 48, 56 -- sublane multiples of 8

    # One fused MXU matmul for all four layers' x-contributions, already transposed:
    #   xz[c, m] = sum_f WxT[c, f] * x[m, f]   (contract the feature axis of both)
    xz = jax.lax.dot_general(
        wxT_ref[...], x_ref[...],
        dimension_numbers=(((1,), (1,)), ((), ())),
        preferred_element_type=f32,
    ) + bxT_ref[...]                               # [64, tile_m] + [64, 1] lane-broadcast

    # layers 1-4 (Dropout = identity at inference); activations stay f32 + lane-dense.
    h1 = jnp.maximum(xz[0:o2], 0.0)                                            # [32, m]
    h2 = jnp.maximum(
        xz[o2:o3] + jnp.dot(w2hT_ref[...], h1, preferred_element_type=f32), 0.0)  # [16, m]
    h3 = jnp.maximum(
        xz[o3:o4] + jnp.dot(w3hT_ref[...], h2, preferred_element_type=f32), 0.0)  # [8, m]
    h4 = jnp.maximum(
        xz[o4:] + jnp.dot(w4hT_ref[...], h3, preferred_element_type=f32), 0.0)    # [8, m]

    # Fused heads: [2, tile_m] logits; tanh only on row 0, sigmoid only on row 1.
    z = jnp.dot(whT_ref[...], h4, preferred_element_type=f32) + bhT_ref[...]   # [2, m]
    tsdf_row = tsdf_scale * jnp.tanh(z[0:1, :])
    occ_row = jax.nn.sigmoid(z[1:2, :])
    out_ref[...] = jnp.concatenate([tsdf_row, occ_row], axis=0).astype(out_ref.dtype)


def translate_mlp_forward(x, params, *, tsdf_scale, out_channels=(32, 16, 8, 8),
                          tile_m=8192):
    """x: [N, 2*len_feature] (bf16 recommended). Returns (tsdf [N,1], occ [N,1]) f32.

    tile_m: multiple of 128. Per-tile VMEM is tiny (<1 MiB even at 8192), so pick
    tile_m to amortize per-grid-step overhead; on v7x prefer cdiv(N, tile_m) to be a
    multiple of 2 and >= 4 so both TensorCores get >= 2 steps each.
    """
    N, F2 = x.shape
    assert tile_m % 128 == 0, "tile_m must be a multiple of 128"
    wxT, bxT, w2hT, w3hT, w4hT, whT, bhT = params

    def const_spec(shape):
        # Constant block index -> Pallas keeps these grid-invariant blocks resident.
        return pl.BlockSpec(shape, lambda i: (0, 0))

    kernel = functools.partial(
        _translate_mlp_kernel, tsdf_scale=tsdf_scale, out_channels=out_channels)

    grid = (pl.cdiv(N, tile_m),)   # ragged last block: OOB outputs are masked on write
    in_specs = [
        pl.BlockSpec((tile_m, F2), lambda i: (i, 0)),   # x, batch-tiled
        const_spec(wxT.shape), const_spec(bxT.shape),
        const_spec(w2hT.shape), const_spec(w3hT.shape), const_spec(w4hT.shape),
        const_spec(whT.shape), const_spec(bhT.shape),
    ]
    out_specs = pl.BlockSpec((2, tile_m), lambda i: (0, i))   # lane-dense output slab

    fused = pl.pallas_call(
        kernel,
        out_shape=jax.ShapeDtypeStruct((2, N), jnp.float32),
        grid_spec=pltpu.PrefetchScalarGridSpec(
            num_scalar_prefetch=0,
            grid=grid,
            in_specs=in_specs,
            out_specs=out_specs,
        ),
        compiler_params=pltpu.CompilerParams(
            dimension_semantics=("parallel",),
            vmem_limit_bytes=32 * 1024 * 1024,   # v5e scoped default is only 16 MiB
        ),
    )(x, wxT, bxT, w2hT, w3hT, w4hT, whT, bhT)

    tsdf = fused[0][:, None]
    occ = fused[1][:, None]
    return tsdf, occ


def init_raw_params(key, len_feature, out_channels=(32, 16, 8, 8),
                    weight_dtype=jnp.bfloat16):
    """Deterministic synthetic params in PyTorch nn.Linear layout (W: [out, in], b: [out]).

    Weights stored in `weight_dtype` (bf16 "checkpoint"); biases f32.
    """
    F2 = 2 * len_feature
    c1, c2, c3, c4 = out_channels

    def lin(k, fan_in, fan_out):
        kw, kb = jax.random.split(k)
        s = 1.0 / jnp.sqrt(jnp.float32(fan_in))
        w = jax.random.uniform(kw, (fan_out, fan_in), jnp.float32, -s, s).astype(weight_dtype)
        b = jax.random.uniform(kb, (fan_out,), jnp.float32, -s, s)
        return w, b

    ks = jax.random.split(key, 6)
    w1, b1 = lin(ks[0], F2, c1)
    w2, b2 = lin(ks[1], F2 + c1, c2)
    w3, b3 = lin(ks[2], F2 + c2, c3)
    w4, b4 = lin(ks[3], F2 + c3, c4)
    wt, bt = lin(ks[4], c4, 1)
    wo, bo = lin(ks[5], c4, 1)
    return dict(w1=w1, b1=b1, w2=w2, b2=b2, w3=w3, b3=b3, w4=w4, b4=b4,
                wt=wt, bt=bt, wo=wo, bo=bo)


def pack_params(raw, len_feature):
    """Pack per-layer PyTorch-layout weights into the kernel's fused/transposed form.

    torch.cat([x, h], dim=1) @ W.T == x @ W[:, :2F].T + h @ W[:, 2F:].T, so the first
    2F input-columns of layers 2-4 consume x (fused into WxT) and the rest consume h.
    """
    F2 = 2 * len_feature
    f32 = jnp.float32
    wxT = jnp.concatenate(
        [raw["w1"], raw["w2"][:, :F2], raw["w3"][:, :F2], raw["w4"][:, :F2]], axis=0
    )                                                                    # [64, 2F] bf16
    bxT = jnp.concatenate(
        [raw["b1"], raw["b2"], raw["b3"], raw["b4"]])[:, None].astype(f32)   # [64, 1]
    w2hT = raw["w2"][:, F2:].astype(f32)                                     # [16, 32]
    w3hT = raw["w3"][:, F2:].astype(f32)                                     # [8, 16]
    w4hT = raw["w4"][:, F2:].astype(f32)                                     # [8, 8]
    whT = jnp.concatenate([raw["wt"], raw["wo"]], axis=0).astype(f32)        # [2, 8]
    bhT = jnp.concatenate([raw["bt"], raw["bo"]])[:, None].astype(f32)       # [2, 1]
    return (wxT, bxT, w2hT, w3hT, w4hT, whT, bhT)


def reference_forward(x, raw, *, tsdf_scale):
    """Literal plain-JAX f32 translation of the PyTorch forward (eval mode)."""
    f32 = jnp.float32
    x = x.astype(f32)
    relu = lambda v: jnp.maximum(v, 0.0)
    lin = lambda h, w, b: h @ w.astype(f32).T + b.astype(f32)
    h1 = relu(lin(x, raw["w1"], raw["b1"]))                                   # Dropout = id
    h2 = relu(lin(jnp.concatenate([x, h1], axis=1), raw["w2"], raw["b2"]))
    h3 = relu(lin(jnp.concatenate([x, h2], axis=1), raw["w3"], raw["b3"]))
    h4 = relu(lin(jnp.concatenate([x, h3], axis=1), raw["w4"], raw["b4"]))
    tsdf = tsdf_scale * jnp.tanh(lin(h4, raw["wt"], raw["bt"]))
    occ = jax.nn.sigmoid(lin(h4, raw["wo"], raw["bo"]))
    return tsdf, occ


if __name__ == "__main__":
    # config: len_feature=16 (input dim 32), tsdf_scale=0.5, eval-mode dropout.
    # TODO(synk): nn.Dropout is train-mode only; implemented as identity (eval mode).
    len_feature = 16
    tsdf_scale = 0.5
    N = 4096
    tile_m = 1024      # grid of 4 parallel steps -> >=2 steps per v7x TensorCore

    key = jax.random.PRNGKey(0)
    kx, kp = jax.random.split(key)
    x = jax.random.normal(kx, (N, 2 * len_feature), jnp.float32).astype(jnp.bfloat16)
    raw = init_raw_params(kp, len_feature)          # PyTorch-layout bf16 weights, f32 biases
    params = pack_params(raw, len_feature)          # fused/transposed kernel params

    tsdf, occ = translate_mlp_forward(x, params, tsdf_scale=tsdf_scale, tile_m=tile_m)
    jax.block_until_ready((tsdf, occ))

    # Literal module reference on the exact same (bf16-rounded) x and weights, in f32.
    tsdf_ref, occ_ref = reference_forward(x, raw, tsdf_scale=tsdf_scale)
    assert tsdf.shape == (N, 1) and occ.shape == (N, 1)
    # Only bf16 MXU operand rounding on the x-matmul differs from the f32 reference.
    assert jnp.allclose(tsdf, tsdf_ref, atol=2e-2), "tsdf mismatch"
    assert jnp.allclose(occ, occ_ref, atol=2e-2), "occupancy mismatch"

    print("KERNEL_OK")
</pallas_src>

<mosaic_0001>
module attributes {stable_mosaic.version = 11 : i64} {
  func.func @_translate_mlp_kernel(%arg0: i32, %arg1: memref<1024x32xbf16, #tpu.memory_space<vmem>>, %arg2: memref<64x32xbf16, #tpu.memory_space<vmem>>, %arg3: memref<64x1xf32, #tpu.memory_space<vmem>>, %arg4: memref<16x32xf32, #tpu.memory_space<vmem>>, %arg5: memref<8x16xf32, #tpu.memory_space<vmem>>, %arg6: memref<8x8xf32, #tpu.memory_space<vmem>>, %arg7: memref<2x8xf32, #tpu.memory_space<vmem>>, %arg8: memref<2x1xf32, #tpu.memory_space<vmem>>, %arg9: memref<2x1024xf32, #tpu.memory_space<vmem>>) attributes {dimension_semantics = [#tpu.dimension_semantics<parallel>], iteration_bounds = array<i64: 4>, scalar_prefetch = 0 : i64, scratch_operands = 0 : i64, tpu.core_type = #tpu.core_type<tc>, window_params = [{transform_indices = @transform_0, window_bounds = array<i64: 1024, 32>}, {pipeline_mode = #tpu.pipeline_mode<synchronous>, transform_indices = @transform_1, window_bounds = array<i64: 64, 32>}, {pipeline_mode = #tpu.pipeline_mode<synchronous>, transform_indices = @transform_2, window_bounds = array<i64: 64, 1>}, {pipeline_mode = #tpu.pipeline_mode<synchronous>, transform_indices = @transform_3, window_bounds = array<i64: 16, 32>}, {pipeline_mode = #tpu.pipeline_mode<synchronous>, transform_indices = @transform_4, window_bounds = array<i64: 8, 16>}, {pipeline_mode = #tpu.pipeline_mode<synchronous>, transform_indices = @transform_5, window_bounds = array<i64: 8, 8>}, {pipeline_mode = #tpu.pipeline_mode<synchronous>, transform_indices = @transform_6, window_bounds = array<i64: 2, 8>}, {pipeline_mode = #tpu.pipeline_mode<synchronous>, transform_indices = @transform_7, window_bounds = array<i64: 2, 1>}, {transform_indices = @transform_8, window_bounds = array<i64: 2, 1024>}]} {
    %c0 = arith.constant 0 : index
    %c0_0 = arith.constant 0 : index
    %0 = vector.load %arg2[%c0, %c0_0] : memref<64x32xbf16, #tpu.memory_space<vmem>>, vector<64x32xbf16>
    %c0_1 = arith.constant 0 : index
    %c0_2 = arith.constant 0 : index
    %1 = vector.load %arg1[%c0_1, %c0_2] : memref<1024x32xbf16, #tpu.memory_space<vmem>>, vector<1024x32xbf16>
    %cst = arith.constant dense<0.000000e+00> : vector<64x1024xf32>
    %2 = tpu.matmul %0, %1, %cst {dimension_numbers = #tpu.dot_dimension_numbers<[1], [1], [0], [0], [0, 0, 1, 0], [], []>} : vector<64x32xbf16>, vector<1024x32xbf16>, vector<64x1024xf32> -> vector<64x1024xf32>
    %c0_3 = arith.constant 0 : index
    %c0_4 = arith.constant 0 : index
    %3 = vector.load %arg3[%c0_3, %c0_4] : memref<64x1xf32, #tpu.memory_space<vmem>>, vector<64x1xf32>
    %4 = vector.broadcast %3 : vector<64x1xf32> to vector<64x1024xf32>
    %5 = arith.addf %2, %4 : vector<64x1024xf32>
    %6 = vector.extract_strided_slice %5 {offsets = [0, 0], sizes = [32, 1024], strides = [1, 1]} : vector<64x1024xf32> to vector<32x1024xf32>
    %cst_5 = arith.constant 0.000000e+00 : f32
    %7 = vector.broadcast %cst_5 : f32 to vector<32x1024xf32>
    %8 = arith.maximumf %6, %7 : vector<32x1024xf32>
    %9 = vector.extract_strided_slice %5 {offsets = [32, 0], sizes = [16, 1024], strides = [1, 1]} : vector<64x1024xf32> to vector<16x1024xf32>
    %c0_6 = arith.constant 0 : index
    %c0_7 = arith.constant 0 : index
    %10 = vector.load %arg4[%c0_6, %c0_7] : memref<16x32xf32, #tpu.memory_space<vmem>>, vector<16x32xf32>
    %cst_8 = arith.constant dense<0.000000e+00> : vector<16x1024xf32>
    %11 = tpu.matmul %10, %8, %cst_8 {dimension_numbers = #tpu.dot_dimension_numbers<[1], [0], [0], [1], [0, 0, 1, 1], [], []>} : vector<16x32xf32>, vector<32x1024xf32>, vector<16x1024xf32> -> vector<16x1024xf32>
    %12 = arith.addf %9, %11 : vector<16x1024xf32>
    %cst_9 = arith.constant 0.000000e+00 : f32
    %13 = vector.broadcast %cst_9 : f32 to vector<16x1024xf32>
    %14 = arith.maximumf %12, %13 : vector<16x1024xf32>
    %15 = vector.extract_strided_slice %5 {offsets = [48, 0], sizes = [8, 1024], strides = [1, 1]} : vector<64x1024xf32> to vector<8x1024xf32>
    %c0_10 = arith.constant 0 : index
    %c0_11 = arith.constant 0 : index
    %16 = vector.load %arg5[%c0_10, %c0_11] : memref<8x16xf32, #tpu.memory_space<vmem>>, vector<8x16xf32>
    %cst_12 = arith.constant dense<0.000000e+00> : vector<8x1024xf32>
    %17 = tpu.matmul %16, %14, %cst_12 {dimension_numbers = #tpu.dot_dimension_numbers<[1], [0], [0], [1], [0, 0, 1, 1], [], []>} : vector<8x16xf32>, vector<16x1024xf32>, vector<8x1024xf32> -> vector<8x1024xf32>
    %18 = arith.addf %15, %17 : vector<8x1024xf32>
    %cst_13 = arith.constant 0.000000e+00 : f32
    %19 = vector.broadcast %cst_13 : f32 to vector<8x1024xf32>
    %20 = arith.maximumf %18, %19 : vector<8x1024xf32>
    %21 = vector.extract_strided_slice %5 {offsets = [56, 0], sizes = [8, 1024], strides = [1, 1]} : vector<64x1024xf32> to vector<8x1024xf32>
    %c0_14 = arith.constant 0 : index
    %c0_15 = arith.constant 0 : index
    %22 = vector.load %arg6[%c0_14, %c0_15] : memref<8x8xf32, #tpu.memory_space<vmem>>, vector<8x8xf32>
    %cst_16 = arith.constant dense<0.000000e+00> : vector<8x1024xf32>
    %23 = tpu.matmul %22, %20, %cst_16 {dimension_numbers = #tpu.dot_dimension_numbers<[1], [0], [0], [1], [0, 0, 1, 1], [], []>} : vector<8x8xf32>, vector<8x1024xf32>, vector<8x1024xf32> -> vector<8x1024xf32>
    %24 = arith.addf %21, %23 : vector<8x1024xf32>
    %cst_17 = arith.constant 0.000000e+00 : f32
    %25 = vector.broadcast %cst_17 : f32 to vector<8x1024xf32>
    %26 = arith.maximumf %24, %25 : vector<8x1024xf32>
    %c0_18 = arith.constant 0 : index
    %c0_19 = arith.constant 0 : index
    %27 = vector.load %arg7[%c0_18, %c0_19] : memref<2x8xf32, #tpu.memory_space<vmem>>, vector<2x8xf32>
    %cst_20 = arith.constant dense<0.000000e+00> : vector<2x1024xf32>
    %28 = tpu.matmul %27, %26, %cst_20 {dimension_numbers = #tpu.dot_dimension_numbers<[1], [0], [0], [1], [0, 0, 1, 1], [], []>} : vector<2x8xf32>, vector<8x1024xf32>, vector<2x1024xf32> -> vector<2x1024xf32>
    %c0_21 = arith.constant 0 : index
    %c0_22 = arith.constant 0 : index
    %29 = vector.load %arg8[%c0_21, %c0_22] : memref<2x1xf32, #tpu.memory_space<vmem>>, vector<2x1xf32>
    %30 = vector.broadcast %29 : vector<2x1xf32> to vector<2x1024xf32>
    %31 = arith.addf %28, %30 : vector<2x1024xf32>
    %32 = vector.extract_strided_slice %31 {offsets = [0, 0], sizes = [1, 1024], strides = [1, 1]} : vector<2x1024xf32> to vector<1x1024xf32>
    %33 = math.tanh %32 : vector<1x1024xf32>
    %cst_23 = arith.constant 5.000000e-01 : f32
    %34 = vector.broadcast %cst_23 : f32 to vector<1x1024xf32>
    %35 = arith.mulf %34, %33 : vector<1x1024xf32>
    %36 = vector.extract_strided_slice %31 {offsets = [1, 0], sizes = [1, 1024], strides = [1, 1]} : vector<2x1024xf32> to vector<1x1024xf32>
    %37 = arith.negf %36 : vector<1x1024xf32>
    %38 = math.exp %37 : vector<1x1024xf32>
    %cst_24 = arith.constant 1.000000e+00 : f32
    %39 = vector.broadcast %cst_24 : f32 to vector<1x1024xf32>
    %40 = arith.addf %39, %38 : vector<1x1024xf32>
    %41 = arith.divf %39, %40 : vector<1x1024xf32>
    %42 = tpu.concatenate %35, %41 in 0 : vector<1x1024xf32>, vector<1x1024xf32> -> vector<2x1024xf32>
    %c0_25 = arith.constant 0 : index
    %c0_26 = arith.constant 0 : index
    %43 = vector.load %arg9[%c0_25, %c0_26] : memref<2x1024xf32, #tpu.memory_space<vmem>>, vector<2x1024xf32>
    tpu.vector_store %arg9[%c0_25, %c0_26], %42 {strides = array<i32>} : memref<2x1024xf32, #tpu.memory_space<vmem>>, vector<2x1024xf32>,
    return
  }
  func.func @transform_0(%arg0: i32) -> (i32, i32) {
    %c0_i32 = arith.constant 0 : i32
    %c0_i32_0 = arith.constant 0 : i32
    return %arg0, %c0_i32 : i32, i32
  }
  func.func @transform_1(%arg0: i32) -> (i32, i32) {
    %c0_i32 = arith.constant 0 : i32
    %c0_i32_0 = arith.constant 0 : i32
    %c0_i32_1 = arith.constant 0 : i32
    return %c0_i32, %c0_i32_0 : i32, i32
  }
  func.func @transform_2(%arg0: i32) -> (i32, i32) {
    %c0_i32 = arith.constant 0 : i32
    %c0_i32_0 = arith.constant 0 : i32
    %c0_i32_1 = arith.constant 0 : i32
    return %c0_i32, %c0_i32_0 : i32, i32
  }
  func.func @transform_3(%arg0: i32) -> (i32, i32) {
    %c0_i32 = arith.constant 0 : i32
    %c0_i32_0 = arith.constant 0 : i32
    %c0_i32_1 = arith.constant 0 : i32
    return %c0_i32, %c0_i32_0 : i32, i32
  }
  func.func @transform_4(%arg0: i32) -> (i32, i32) {
    %c0_i32 = arith.constant 0 : i32
    %c0_i32_0 = arith.constant 0 : i32
    %c0_i32_1 = arith.constant 0 : i32
    return %c0_i32, %c0_i32_0 : i32, i32
  }
  func.func @transform_5(%arg0: i32) -> (i32, i32) {
    %c0_i32 = arith.constant 0 : i32
    %c0_i32_0 = arith.constant 0 : i32
    %c0_i32_1 = arith.constant 0 : i32
    return %c0_i32, %c0_i32_0 : i32, i32
  }
  func.func @transform_6(%arg0: i32) -> (i32, i32) {
    %c0_i32 = arith.constant 0 : i32
    %c0_i32_0 = arith.constant 0 : i32
    %c0_i32_1 = arith.constant 0 : i32
    return %c0_i32, %c0_i32_0 : i32, i32
  }
  func.func @transform_7(%arg0: i32) -> (i32, i32) {
    %c0_i32 = arith.constant 0 : i32
    %c0_i32_0 = arith.constant 0 : i32
    %c0_i32_1 = arith.constant 0 : i32
    return %c0_i32, %c0_i32_0 : i32, i32
  }
  func.func @transform_8(%arg0: i32) -> (i32, i32) {
    %c0_i32 = arith.constant 0 : i32
    %c0_i32_0 = arith.constant 0 : i32
    return %c0_i32, %arg0 : i32, i32
  }
}

</mosaic_0001>

<bundles_post_ra>
// kernel: tpu_custom_call.1
= control target key start
LH: loop header
LB: loop body
LE: loop exit
PB: predicated region body
PF: predicated region fallthrough
CT: control target
= control target key end

     0   :  { %13 = vsyncpa [#allocation3], 0  ;;  %s3893_s0 = inlined_call_operand.vmem [shape: bf16[4096,32], index: 0, kind: input, shape index: {}]   ;;  %s3894_s1 = inlined_call_operand.vmem [shape: bf16[64,32], index: 1, kind: input, shape index: {}]   ;;  %s3895_s2 = inlined_call_operand.vmem [shape: f32[64,1], index: 2, kind: input, shape index: {}]   ;;  %s3896_s3 = inlined_call_operand.vmem [shape: f32[16,32], index: 3, kind: input, shape index: {}]   ;;  %s3897_s4 = inlined_call_operand.vmem [shape: f32[8,16], index: 4, kind: input, shape index: {}]   ;;  %s3898_s5 = inlined_call_operand.vmem [shape: f32[8,8], index: 5, kind: input, shape index: {}]   ;;  %s3899_s6 = inlined_call_operand.vmem [shape: f32[2,8], index: 6, kind: input, shape index: {}]   ;;  %s3900_s7 = inlined_call_operand.vmem [shape: f32[2,1], index: 7, kind: input, shape index: {}]   ;;  %s3901_s8 = inlined_call_operand.hbm [shape: f32[2,4096], index: 8, kind: output, shape index: {}]  }
   0x1   :  { %15 = vsyncpa [#allocation3 + $0x1], 0  ;;  %s3330_s27 = smov 0   ;;  %s3332_s28 = smov 0  }
   0x2   :  { %s3334_s29 = smov 0   ;;  %s3336_s30 = smov 0  }
   0x3 LB: > { %s3351_s9 = sadd.s32 4294967295, %s3279_s30   ;;  %s2806_s10 = sadd.s32 4294967294, %s3279_s30   ;;  %s3279_s30 = sphi %s3336_s30, %s3907_s30   ;;  %s3275_s29 = sphi %s3334_s29, %s3906_s29   ;;  %s3271_s28 = sphi %s3332_s28, %s3905_s28   ;;  %s3267_s27 = sphi %s3330_s27, %s3904_s27  }
   0x4   : > { %s3355_s11 = sadd.s32 1, %s3279_s30   ;;  %s201_s12 = sadd.s32 1, %s3275_s29 }
   0x5   : > { %s198_s13 = ssub.s32 %s3279_s30, %s3355_s11  ;;  %p211_p0 = scmp.ne.s32.totalorder %s3275_s29, %s3271_s28 }
   0x6   : > { %p199_p1 = scmp.eq.s32.totalorder %s198_s13, 0  ;;  %p212_p2 = scmp.eq.s32.totalorder %s3351_s9, 3 }
   0x7   : > { %p217_p3 = scmp.ne.s32.totalorder %s3271_s28, %s3267_s27  ;;  %p218_p4 = scmp.eq.s32.totalorder %s2806_s10, 3 }
   0x8   : > { %s3366_s14 = scalar_select %p199_p1, %s3275_s29, %s201_s12  }
   0x9   : > { %p3368_p5 = por %p212_p2, %p211_p0  ;;  %p3372_p6 = por %p218_p4, %p217_p3 }
   0xa   : > { %p2809_p7 = scmp.ge.s32.totalorder %s3279_s30, 1  ;;  %p266_p8 = scmp.lt.s32.totalorder %s3279_s30, 5 }
   0xc   : > { %p267_p9 = pnand %p2809_p7, %p266_p8 }
   0xd   : > { %s2811_s17 = sshll.u32 (!%p267_p9), %s3351_s9, 7 }
   0xe   : > { %270 = sbr.rel (%p267_p9) target bundleno = 1231 (0x4cf), region = 52  ;;  %p301_p10 = scmp.lt.s32.totalorder (!%p267_p9), %s2811_s17, 511 }
  0x13   : > { %v3382_v0 = vld [vmem:[%s3894_s1] sm:$0xff]   ;;  %vm832_vm0 = vcmask 261120   ;;  %s3909_s17 = smov (!%p301_p10, %s2811_s17), 511  ;;  %v3281_v11 = vmov 0   ;;  %v445_v54 = vld [vmem:[%s3895_s2 + $0x8] sm:$0xff]  ;;  %v447_v55 = vld [vmem:[%s3895_s2 + $0x18] sm:$0xff] }
  0x14   : > { %2947 = vmatprep.mubr.msk.bf16.mxu0 %vm832_vm0, %v3382_v0  ;;  %2971 = vmatprep.mubr.msk.bf16.mxu1 %vm832_vm0, %v3382_v0  ;;  %s2812_s20 = sshll.u32 %s3909_s17, 2  ;;  %v3473_v57 = vld [vmem:[%s3894_s1 + $0x8] sm:$0xff]   ;;  %v444_v61 = vld [vmem:[%s3895_s2] sm:$0xff]  ;;  %v446_v63 = vld [vmem:[%s3895_s2 + $0x10] sm:$0xff]  ;;  %vm1710_vm1 = vcmask 130048   ;;  %vm2015_vm2 = vcmask 64512  }
  0x15   : > { %s3391_s23 = scalar_lea.vmem %s3893_s0, %s2812_s20  ;;  %3102 = vset.pattern.permute.xlu1 %v3281_v11  ;;  %3101 = vset.pattern.permute.xlu0 %v3281_v11  ;;  %vm2677_vm3 = vcmask 1040384   ;;  %s297_s20 = sand.u32 1, %s3271_s28  }
  0x16   : > { %v3103_v1 = vld [vmem:[%s3391_s23 + $0x78] sm:$0xff]   ;;  %v3107_v6 = vld [vmem:[%s3391_s23 + $0x70] sm:$0xff]   ;;  %v3111_v13 = vld [vmem:[%s3391_s23 + $0x68] sm:$0xff]   ;;  %459 = vperm.xlu1 %3102, %v445_v54   ;;  %469 = vperm.xlu0 %3101, %v447_v55   ;;  %s2810_s21 = sshll.u32 %s297_s20, 4  ;;  %s2733_s12 = scalar_lea.sflag [#allocation3], %s297_s20 }
  0x17   : > { %v3104_v2 = vld [vmem:[%s3391_s23 + $0xf8] sm:$0xff]   ;;  %3027 = vmatprep.subr.msk.bf16.mxu0 %vm832_vm0, %v3103_v1  ;;  %v3108_v8 = vld [vmem:[%s3391_s23 + $0xf0] sm:$0xff]   ;;  %v3112_v15 = vld [vmem:[%s3391_s23 + $0xe8] sm:$0xff]   ;;  %s3843_s22 = scalar_lea.vmem [#allocation2], %s2810_s21  ;;  %s3284_s17 = smov [#allocation2]  }
  0x18   : > { %v3105_v3 = vld [vmem:[%s3391_s23 + $0x38] sm:$0xff]   ;;  %3035 = vmatprep.subr.msk.bf16.mxu1 %vm832_vm0, %v3104_v2  ;;  %v3109_v9 = vld [vmem:[%s3391_s23 + $0x30] sm:$0xff]   ;;  %v3113_v16 = vld [vmem:[%s3391_s23 + $0x28] sm:$0xff]   ;;  %s2747_s24 = sshll.u32 %s3843_s22, 4  ;;  %s3223_s18 = sshll.u32 %s3284_s17, 4  ;;  %s2748_s24 = int_to_ptr.vmem [resolvable:$true] %s2747_s24  ;;  %s3224_s18 = int_to_ptr.vmem [resolvable:$false] %s3223_s18 }
  0x19   : > { %v3106_v4 = vld [vmem:[%s3391_s23 + $0xb8] sm:$0xff]   ;;  %v867_v5 = vsel %vm832_vm0, %v3105_v3, 0  ;;  %v3110_v10 = vld [vmem:[%s3391_s23 + $0xb0] sm:$0xff]   ;;  %v864_v12 = vsel %vm832_vm0, %v3109_v9, 0  ;;  %v3114_v17 = vld [vmem:[%s3391_s23 + $0xa8] sm:$0xff]   ;;  %v861_v18 = vsel %vm832_vm0, %v3113_v16, 0  ;;  %p3226_p0 = scmp.lt.s32.totalorder %s2748_s24, %s3224_s18 }
  0x1a   : > { %2932 = vmatpush3.bf16.xpose.msra.mxu0 %v867_v5  ;;  %v915_v7 = vsel %vm832_vm0, %v3106_v4, 0  ;;  %v912_v14 = vsel %vm832_vm0, %v3110_v10, 0  ;;  %v3115_v19 = vld [vmem:[%s3391_s23 + $0x60] sm:$0xff]   ;;  %v909_v20 = vsel %vm832_vm0, %v3114_v17, 0  ;;  %v3119_v25 = vld [vmem:[%s3391_s23 + $0x58] sm:$0xff]   ;;  %v3123_v31 = vld [vmem:[%s3391_s23 + $0x50] sm:$0xff]   ;;  %454 = vperm.xlu1 %3102, %v444_v61  }
  0x1b   : > { %2956 = vmatpush3.bf16.xpose.msra.mxu1 %v915_v7  ;;  %3028 = vmatprep.subr.msk.bf16.mxu0 %vm832_vm0, %v3107_v6  ;;  %v3116_v21 = vld [vmem:[%s3391_s23 + $0xe0] sm:$0xff]   ;;  %v3120_v27 = vld [vmem:[%s3391_s23 + $0xd8] sm:$0xff]   ;;  %v3124_v33 = vld [vmem:[%s3391_s23 + $0xd0] sm:$0xff]   ;;  %s3219_s13 = scalar_lea.vmem %s2748_s24, 256 }
  0x1c   : > { %3036 = vmatprep.subr.msk.bf16.mxu1 %vm832_vm0, %v3108_v8  ;;  %v3117_v22 = vld [vmem:[%s3391_s23 + $0x20] sm:$0xff]   ;;  %v3121_v28 = vld [vmem:[%s3391_s23 + $0x18] sm:$0xff]   ;;  %v3125_v34 = vld [vmem:[%s3391_s23 + $0x10] sm:$0xff]   ;;  %464 = vperm.xlu0 %3101, %v446_v63   ;;  %p3220_p11 = scmp.ne.s32.totalorder %s2748_s24, %s3219_s13 }
  0x1d   : > { %v3118_v23 = vld [vmem:[%s3391_s23 + $0xa0] sm:$0xff]   ;;  %v858_v24 = vsel %vm832_vm0, %v3117_v22, 0  ;;  %v3122_v29 = vld [vmem:[%s3391_s23 + $0x98] sm:$0xff]   ;;  %v855_v30 = vsel %vm832_vm0, %v3121_v28, 0  ;;  %v3126_v35 = vld [vmem:[%s3391_s23 + $0x90] sm:$0xff]   ;;  %v852_v36 = vsel %vm832_vm0, %v3125_v34, 0 }
  0x1e   : > { %v906_v26 = vsel %vm832_vm0, %v3118_v23, 0  ;;  %v903_v32 = vsel %vm832_vm0, %v3122_v29, 0  ;;  %v3127_v37 = vld [vmem:[%s3391_s23 + $0x48] sm:$0xff]   ;;  %v900_v38 = vsel %vm832_vm0, %v3126_v35, 0  ;;  %v3131_v43 = vld [vmem:[%s3391_s23 + $0x40] sm:$0xff]   ;;  %v3136_v49 = vld [vmem:[%s3391_s23 + $0x178] sm:$0xff]   ;;  %p3221_p12 = pnand %p3220_p11, %p3368_p5 }
  0x1f   : > { %v3128_v39 = vld [vmem:[%s3391_s23 + $0xc8] sm:$0xff]   ;;  %v3132_v45 = vld [vmem:[%s3391_s23 + $0xc0] sm:$0xff]   ;;  %v3137_v51 = vld [vmem:[%s3391_s23 + $0x1f8] sm:$0xff]  }
  0x20   : > { %v3129_v40 = vld [vmem:[%s3391_s23 + $0x8] sm:$0xff]   ;;  %v3133_v46 = vld [vmem:[%s3391_s23] sm:$0xff]   ;;  %v3138_v52 = vld [vmem:[%s3391_s23 + $0x138] sm:$0xff]   ;;  %p3222_p13 = pneg %p3221_p12 }
  0x21   : > { %v3130_v41 = vld [vmem:[%s3391_s23 + $0x88] sm:$0xff]   ;;  %v849_v42 = vsel %vm832_vm0, %v3129_v40, 0  ;;  %v3134_v47 = vld [vmem:[%s3391_s23 + $0x80] sm:$0xff]   ;;  %v846_v48 = vsel %vm832_vm0, %v3133_v46, 0  ;;  %v3139_v53 = vld [vmem:[%s3391_s23 + $0x1b8] sm:$0xff]   ;;  %v963_v56 = vsel %vm832_vm0, %v3138_v52, 0 }
  0x22   : > { %2934 = vmatpush3.bf16.xpose.msra.mxu0 %v864_v12  ;;  %v897_v44 = vsel %vm832_vm0, %v3130_v41, 0  ;;  %v894_v50 = vsel %vm832_vm0, %v3134_v47, 0  ;;  %v1011_v58 = vsel %vm832_vm0, %v3139_v53, 0  ;;  %v3141_v59 = vld [vmem:[%s3391_s23 + $0x170] sm:$0xff]   ;;  %v448_v2 = vld [vmem:[%s3895_s2 + $0x20] sm:$0xff]  ;;  %v3145_v4 = vld [vmem:[%s3391_s23 + $0x168] sm:$0xff]  }
  0x23   : > { %2958 = vmatpush3.bf16.xpose.msra.mxu1 %v912_v14  ;;  %3029 = vmatprep.subr.msk.bf16.mxu0 %vm832_vm0, %v3111_v13  ;;  %v3142_v60 = vld [vmem:[%s3391_s23 + $0x1f0] sm:$0xff]   ;;  %v3146_v6 = vld [vmem:[%s3391_s23 + $0x1e8] sm:$0xff]   ;;  %v451_v10 = vld [vmem:[%s3895_s2 + $0x38] sm:$0xff] }
  0x24   : > { %3037 = vmatprep.subr.msk.bf16.mxu1 %vm832_vm0, %v3112_v15  ;;  %v3143_v62 = vld [vmem:[%s3391_s23 + $0x130] sm:$0xff]   ;;  %474 = vperm.xlu1 %3102, %v448_v2   ;;  %v449_v8 = vld [vmem:[%s3895_s2 + $0x28] sm:$0xff]  ;;  %v3149_v14 = vld [vmem:[%s3391_s23 + $0x160] sm:$0xff]  }
  0x25   : > { %v3144_v1 = vld [vmem:[%s3391_s23 + $0x1b0] sm:$0xff]   ;;  %v960_v3 = vsel %vm832_vm0, %v3143_v62, 0  ;;  %v3147_v9 = vld [vmem:[%s3391_s23 + $0x128] sm:$0xff]   ;;  %479 = vperm.xlu0 %3101, %v449_v8   ;;  %v3150_v16 = vld [vmem:[%s3391_s23 + $0x1e0] sm:$0xff]  }
  0x26   : > { %v1008_v5 = vsel %vm832_vm0, %v3144_v1, 0  ;;  %v3506_v7 = vld [vmem:[%s3894_s1 + $0x10] sm:$0xff]   ;;  %v3148_v11 = vld [vmem:[%s3391_s23 + $0x1a8] sm:$0xff]   ;;  %v957_v13 = vsel %vm832_vm0, %v3147_v9, 0  ;;  %v3536_v17 = vld [vmem:[%s3894_s1 + $0x18] sm:$0xff]  }
  0x27   : > { %v450_v12 = vld [vmem:[%s3895_s2 + $0x30] sm:$0xff]  ;;  %v1005_v15 = vsel %vm832_vm0, %v3148_v11, 0  ;;  %v3153_v22 = vld [vmem:[%s3391_s23 + $0x158] sm:$0xff]   ;;  %v3163_v34 = vld [vmem:[%s3391_s23 + $0x148] sm:$0xff]  }
  0x28   : > { %489 = vperm.xlu1 %3102, %v451_v10   ;;  %v3158_v28 = vld [vmem:[%s3391_s23 + $0x150] sm:$0xff]   ;;  %v3167_v40 = vld [vmem:[%s3391_s23 + $0x140] sm:$0xff]  }
  0x29   : > { %484 = vperm.xlu0 %3101, %v450_v12  }
  0x2a   : > { %2936 = vmatpush3.bf16.xpose.msra.mxu0 %v861_v18  ;;  %v2320_v18 = vld [vmem:[%s3900_s7] sm:$0x3] }
  0x2b   : > { %2960 = vmatpush3.bf16.xpose.msra.mxu1 %v909_v20  ;;  %3030 = vmatprep.subr.msk.bf16.mxu0 %vm832_vm0, %v3115_v19  ;;  %v3151_v19 = vld [vmem:[%s3391_s23 + $0x120] sm:$0xff]  }
  0x2c   : > { %3038 = vmatprep.subr.msk.bf16.mxu1 %vm832_vm0, %v3116_v21  ;;  %v3152_v20 = vld [vmem:[%s3391_s23 + $0x1a0] sm:$0xff]   ;;  %v954_v21 = vsel %vm832_vm0, %v3151_v19, 0 }
  0x2d   : > { %2323 = vperm.xlu0 %3101, %v2320_v18   ;;  %v1002_v23 = vsel %vm832_vm0, %v3152_v20, 0 }
  0x32   : > { %2938 = vmatpush3.bf16.xpose.msra.mxu0 %v858_v24  ;;  %v3154_v24 = vld [vmem:[%s3391_s23 + $0x1d8] sm:$0xff]  }
  0x33   : > { %2962 = vmatpush3.bf16.xpose.msra.mxu1 %v906_v26  ;;  %3031 = vmatprep.subr.msk.bf16.mxu0 %vm832_vm0, %v3119_v25  ;;  %v3155_v25 = vld [vmem:[%s3391_s23 + $0x118] sm:$0xff]  }
  0x34   : > { %3039 = vmatprep.subr.msk.bf16.mxu1 %vm832_vm0, %v3120_v27  ;;  %v3156_v26 = vld [vmem:[%s3391_s23 + $0x198] sm:$0xff]   ;;  %v951_v27 = vsel %vm832_vm0, %v3155_v25, 0 }
  0x35   : > { %v999_v29 = vsel %vm832_vm0, %v3156_v26, 0 }
  0x3a   : > { %2940 = vmatpush3.bf16.xpose.msra.mxu0 %v855_v30  ;;  %v3159_v30 = vld [vmem:[%s3391_s23 + $0x1d0] sm:$0xff]  }
  0x3b   : > { %2964 = vmatpush3.bf16.xpose.msra.mxu1 %v903_v32  ;;  %3032 = vmatprep.subr.msk.bf16.mxu0 %vm832_vm0, %v3123_v31  ;;  %v3160_v31 = vld [vmem:[%s3391_s23 + $0x110] sm:$0xff]  }
  0x3c   : > { %3040 = vmatprep.subr.msk.bf16.mxu1 %vm832_vm0, %v3124_v33  ;;  %v3161_v32 = vld [vmem:[%s3391_s23 + $0x190] sm:$0xff]   ;;  %v948_v33 = vsel %vm832_vm0, %v3160_v31, 0 }
  0x3d   : > { %v996_v35 = vsel %vm832_vm0, %v3161_v32, 0 }
  0x42   : > { %2942 = vmatpush3.bf16.xpose.msra.mxu0 %v852_v36  ;;  %v3164_v36 = vld [vmem:[%s3391_s23 + $0x1c8] sm:$0xff]  }
  0x43   : > { %2966 = vmatpush3.bf16.xpose.msra.mxu1 %v900_v38  ;;  %3033 = vmatprep.subr.msk.bf16.mxu0 %vm832_vm0, %v3127_v37  ;;  %v3165_v37 = vld [vmem:[%s3391_s23 + $0x108] sm:$0xff]  }
  0x44   : > { %3041 = vmatprep.subr.msk.bf16.mxu1 %vm832_vm0, %v3128_v39  ;;  %v3166_v38 = vld [vmem:[%s3391_s23 + $0x188] sm:$0xff]   ;;  %v945_v39 = vsel %vm832_vm0, %v3165_v37, 0 }
  0x45   : > { %v993_v41 = vsel %vm832_vm0, %v3166_v38, 0  ;;  %v3662_v37 = vld [vmem:[%s3896_s3 + $0x8] sm:$0xff] }
  0x4a   : > { %2944 = vmatpush3.bf16.xpose.msra.mxu0 %v849_v42  ;;  %v3168_v42 = vld [vmem:[%s3391_s23 + $0x1c0] sm:$0xff]  }
  0x4b   : > { %2968 = vmatpush3.bf16.xpose.msra.mxu1 %v897_v44  ;;  %3034 = vmatprep.subr.msk.bf16.mxu0 %vm832_vm0, %v3131_v43  ;;  %v3169_v43 = vld [vmem:[%s3391_s23 + $0x100] sm:$0xff]  }
  0x4c   : > { %3042 = vmatprep.subr.msk.bf16.mxu1 %vm832_vm0, %v3132_v45  ;;  %v3170_v44 = vld [vmem:[%s3391_s23 + $0x180] sm:$0xff]   ;;  %v942_v45 = vsel %vm832_vm0, %v3169_v43, 0  ;;  %s2930_s23 = sshll.u32 %s3351_s9, 8  ;;  %s3225_s9 = scalar_lea.vmem %s3224_s18, 512 }
  0x4d   : > { %v990_v46 = vsel %vm832_vm0, %v3170_v44, 0  ;;  %s2745_s10 = scalar_lea.hbm %s3901_s8, %s2930_s23  ;;  %p3227_p1 = scmp.lt.s32.totalorder %s3225_s9, %s3219_s13 }
  0x4f   : > { %p3228_p2 = por %p3227_p1, %p3226_p0 }
  0x51   : > { %p3229_p3 = pnand %p3228_p2, %p3222_p13 }
  0x52   : > { %2946 = vmatpush3.bf16.xpose.msra.mxu0 %v846_v48 }
  0x53   : > { %2970 = vmatpush3.bf16.xpose.msra.mxu1 %v894_v50  ;;  %3043 = vmatprep.subr.msk.bf16.mxu0 %vm832_vm0, %v3136_v49 }
  0x54   : > { %3051 = vmatprep.subr.msk.bf16.mxu1 %vm832_vm0, %v3137_v51 }
  0x59   : > { %2948 = vmatmul.mubr.msk.bf16.vlgmr.msra.gmra.mxu0 %vm832_vm0, %v3382_v0 }
  0x5a   : > { %2972 = vmatmul.mubr.msk.bf16.vlgmr.msra.gmra.mxu1 %vm832_vm0, %v3382_v0  ;;  %2980 = vmatpush3.bf16.xpose.msra.mxu0 %v963_v56 }
  0x5b   : > { %3004 = vmatpush3.bf16.xpose.msra.mxu1 %v1011_v58  ;;  %2949 = vmatprep.mubr.msk.bf16.mxu0 %vm832_vm0, %v3473_v57 }
  0x5c   : > { %2973 = vmatprep.mubr.msk.bf16.mxu1 %vm832_vm0, %v3473_v57  ;;  %3044 = vmatprep.subr.msk.bf16.mxu0 %vm832_vm0, %v3141_v59 }
  0x5d   : > { %3052 = vmatprep.subr.msk.bf16.mxu1 %vm832_vm0, %v3142_v60 }
  0x61   : > { %2950 = vmatmul.mubr.msk.bf16.gmra.mxu0 %vm832_vm0, %v3473_v57 }
  0x62   : > { %2974 = vmatmul.mubr.msk.bf16.gmra.mxu1 %vm832_vm0, %v3473_v57  ;;  %2982 = vmatpush3.bf16.xpose.msra.mxu0 %v960_v3 }
  0x63   : > { %3006 = vmatpush3.bf16.xpose.msra.mxu1 %v1008_v5  ;;  %3045 = vmatprep.subr.msk.bf16.mxu0 %vm832_vm0, %v3145_v4 }
  0x64   : > { %3053 = vmatprep.subr.msk.bf16.mxu1 %vm832_vm0, %v3146_v6  ;;  %2951 = vmatprep.mubr.msk.bf16.mxu0 %vm832_vm0, %v3506_v7 }
  0x65   : > { %2975 = vmatprep.mubr.msk.bf16.mxu1 %vm832_vm0, %v3506_v7 }
  0x69   : > { %2952 = vmatmul.mubr.msk.bf16.gmra.mxu0 %vm832_vm0, %v3506_v7 }
  0x6a   : > { %2984 = vmatpush3.bf16.xpose.msra.mxu0 %v957_v13  ;;  %2976 = vmatmul.mubr.msk.bf16.gmra.mxu1 %vm832_vm0, %v3506_v7 }
  0x6b   : > { %3008 = vmatpush3.bf16.xpose.msra.mxu1 %v1005_v15  ;;  %3046 = vmatprep.subr.msk.bf16.mxu0 %vm832_vm0, %v3149_v14 }
  0x6c   : > { %3054 = vmatprep.subr.msk.bf16.mxu1 %vm832_vm0, %v3150_v16  ;;  %2953 = vmatprep.mubr.msk.bf16.mxu0 %vm832_vm0, %v3536_v17 }
  0x6d   : > { %2977 = vmatprep.mubr.msk.bf16.mxu1 %vm832_vm0, %v3536_v17 }
  0x71   : > { %2954 = vmatmul.mubr.msk.bf16.gmra.mxu0 %vm832_vm0, %v3536_v17 }
  0x72   : > { %2986 = vmatpush3.bf16.xpose.msra.mxu0 %v954_v21  ;;  %2978 = vmatmul.mubr.msk.bf16.gmra.mxu1 %vm832_vm0, %v3536_v17 }
  0x73   : > { %3010 = vmatpush3.bf16.xpose.msra.mxu1 %v1002_v23  ;;  %3047 = vmatprep.subr.msk.bf16.mxu0 %vm832_vm0, %v3153_v22 }
  0x74   : > { %3055 = vmatprep.subr.msk.bf16.mxu1 %vm832_vm0, %v3154_v24  ;;  %2995 = vmatprep.mubr.msk.bf16.mxu0 %vm832_vm0, %v3382_v0 }
  0x75   : > { %3019 = vmatprep.mubr.msk.bf16.mxu1 %vm832_vm0, %v3382_v0 }
  0x7a   : > { %2988 = vmatpush3.bf16.xpose.msra.mxu0 %v951_v27 }
  0x7b   : > { %3012 = vmatpush3.bf16.xpose.msra.mxu1 %v999_v29  ;;  %3048 = vmatprep.subr.msk.bf16.mxu0 %vm832_vm0, %v3158_v28 }
  0x7c   : > { %3056 = vmatprep.subr.msk.bf16.mxu1 %vm832_vm0, %v3159_v30 }
  0x82   : > { %2990 = vmatpush3.bf16.xpose.msra.mxu0 %v948_v33 }
  0x83   : > { %3014 = vmatpush3.bf16.xpose.msra.mxu1 %v996_v35  ;;  %3049 = vmatprep.subr.msk.bf16.mxu0 %vm832_vm0, %v3163_v34  ;;  %v3652_v35 = vld [vmem:[%s3896_s3] sm:$0xff] }
  0x84   : > { %3057 = vmatprep.subr.msk.bf16.mxu1 %vm832_vm0, %v3164_v36 }
  0x8a   : > { %2992 = vmatpush3.bf16.xpose.msra.mxu0 %v945_v39 }
  0x8b   : > { %3016 = vmatpush3.bf16.xpose.msra.mxu1 %v993_v41  ;;  %3050 = vmatprep.subr.msk.bf16.mxu0 %vm832_vm0, %v3167_v40 }
  0x8c   : > { %3058 = vmatprep.subr.msk.bf16.mxu1 %vm832_vm0, %v3168_v42 }
  0x91   : > { %v3625_v52 = vpop.permute.xlu0 %469 }
  0x92   : > { %2994 = vmatpush3.bf16.xpose.msra.mxu0 %v942_v45 }
  0x93   : > { %3018 = vmatpush3.bf16.xpose.msra.mxu1 %v990_v46 }
  0x97   : > { %v3629_v60 = vpop.permute.xlu0 %464 }
  0x99   : > { %2996 = vmatmul.mubr.msk.bf16.vlgmr.msra.gmra.mxu0 %vm832_vm0, %v3382_v0 }
  0x9a   : > { %3020 = vmatmul.mubr.msk.bf16.vlgmr.msra.gmra.mxu1 %vm832_vm0, %v3382_v0  ;;  %2997 = vmatprep.mubr.msk.bf16.mxu0 %vm832_vm0, %v3473_v57  ;;  %v3282_v0 = vmov 0.0  }
  0x9b   : > { %3021 = vmatprep.mubr.msk.bf16.mxu1 %vm832_vm0, %v3473_v57 }
  0xa1   : > { %2998 = vmatmul.mubr.msk.bf16.gmra.mxu0 %vm832_vm0, %v3473_v57 }
  0xa2   : > { %3022 = vmatmul.mubr.msk.bf16.gmra.mxu1 %vm832_vm0, %v3473_v57  ;;  %2999 = vmatprep.mubr.msk.bf16.mxu0 %vm832_vm0, %v3506_v7  ;;  %v3627_v57 = vpop.permute.xlu1 %459 }
  0xa3   : > { %3023 = vmatprep.mubr.msk.bf16.mxu1 %vm832_vm0, %v3506_v7 }
  0xa6   : > { %v3638_v10 = vpop.permute.xlu1 %454 }
  0xa9   : > { %3000 = vmatmul.mubr.msk.bf16.gmra.mxu0 %vm832_vm0, %v3506_v7 }
  0xaa   : > { %3024 = vmatmul.mubr.msk.bf16.gmra.mxu1 %vm832_vm0, %v3506_v7  ;;  %3001 = vmatprep.mubr.msk.bf16.mxu0 %vm832_vm0, %v3536_v17 }
  0xab   : > { %3025 = vmatprep.mubr.msk.bf16.mxu1 %vm832_vm0, %v3536_v17 }
  0xb1   : > { %3002 = vmatmul.mubr.msk.bf16.gmra.mxu0 %vm832_vm0, %v3536_v17 }
  0xb2   : > { %3026 = vmatmul.mubr.msk.bf16.gmra.mxu1 %vm832_vm0, %v3536_v17  ;;  %1433 = vmatprep.mubr.f32.mxu0 %v3282_v0 }
  0xb3   : > { %1510 = vmatprep.mubr.f32.mxu1 %v3282_v0 }
 0x119   : > { %v1071_v47 = vpop.f32.mrf.mxu0 }
 0x11a   : > { %v1144_v48 = vpop.f32.mrf.mxu1  ;;  %v1072_v26 = vadd.f32 %v1071_v47, %v3638_v10 }
 0x11b   : > { %v1073_v49 = vpop.f32.mrf.mxu0  ;;  %v1145_v28 = vadd.f32 %v1144_v48, %v3638_v10 }
 0x11c   : > { %v1146_v50 = vpop.f32.mrf.mxu1  ;;  %v1074_v22 = vadd.f32 %v1073_v49, %v3638_v10  ;;  %v1329_v34 = vmax.f32 %v1072_v26, 0.0 }
 0x11d   : > { %v1075_v51 = vpop.f32.mrf.mxu0  ;;  %v1147_v25 = vadd.f32 %v1146_v50, %v3638_v10  ;;  %v1331_v36 = vmax.f32 %v1145_v28, 0.0 }
 0x11e   : > { %v1148_v53 = vpop.f32.mrf.mxu1  ;;  %v1076_v11 = vadd.f32 %v1075_v51, %v3627_v57  ;;  %v1330_v31 = vmax.f32 %v1074_v22, 0.0 }
 0x11f   : > { %v1077_v54 = vpop.f32.mrf.mxu0  ;;  %v1149_v23 = vadd.f32 %v1148_v53, %v3627_v57  ;;  %v1332_v33 = vmax.f32 %v1147_v25, 0.0 }
 0x120   : > { %v1150_v55 = vpop.f32.mrf.mxu1  ;;  %v1078_v14 = vadd.f32 %v1077_v54, %v3627_v57  ;;  %v1337_v29 = vmax.f32 %v1076_v11, 0.0 }
 0x121   : > { %v1081_v56 = vpop.f32.mrf.mxu0  ;;  %v1151_v18 = vadd.f32 %v1150_v55, %v3627_v57  ;;  %v1339_v32 = vmax.f32 %v1149_v23, 0.0 }
 0x122   : > { %v1154_v58 = vpop.f32.mrf.mxu1  ;;  %v1082_v6 = vadd.f32 %v1081_v56, %v3629_v60  ;;  %v1338_v27 = vmax.f32 %v1078_v14, 0.0 }
 0x123   : > { %v1083_v59 = vpop.f32.mrf.mxu0  ;;  %v1155_v9 = vadd.f32 %v1154_v58, %v3629_v60  ;;  %v1340_v30 = vmax.f32 %v1151_v18, 0.0 }
 0x124   : > { %v1156_v61 = vpop.f32.mrf.mxu1  ;;  %v1084_v2 = vadd.f32 %v1083_v59, %v3629_v60  ;;  %v1345_v21 = vmax.f32 %v1082_v6, 0.0 }
 0x125   : > { %v1085_v62 = vpop.f32.mrf.mxu0  ;;  %v1157_v5 = vadd.f32 %v1156_v61, %v3629_v60  ;;  %v1347_v24 = vmax.f32 %v1155_v9, 0.0 }
 0x126   : > { %v1086_v63 = vadd.f32 %v1085_v62, %v3625_v52  ;;  %v1158_v1 = vpop.f32.mrf.mxu1  ;;  %v1346_v17 = vmax.f32 %v1084_v2, 0.0 }
 0x127   : > { %v1159_v3 = vadd.f32 %v1158_v1, %v3625_v52  ;;  %v1087_v4 = vpop.f32.mrf.mxu0  ;;  %v1348_v20 = vmax.f32 %v1157_v5, 0.0 }
 0x128   : > { %v1088_v7 = vadd.f32 %v1087_v4, %v3625_v52  ;;  %v1160_v8 = vpop.f32.mrf.mxu1  ;;  %v1353_v12 = vmax.f32 %v1086_v63, 0.0 }
 0x129   : > { %v1161_v13 = vadd.f32 %v1160_v8, %v3625_v52  ;;  %v1355_v15 = vmax.f32 %v1159_v3, 0.0  ;;  %v3671_v38 = vpop.f32.mrf.mxu0 }
 0x12a   : > { %v1354_v16 = vmax.f32 %v1088_v7, 0.0  ;;  %v3673_v39 = vpop.f32.mrf.mxu1 }
 0x12b   : > { %v1356_v19 = vmax.f32 %v1161_v13, 0.0  ;;  %v3675_v40 = vpop.f32.mrf.mxu0 }
 0x12c   : > { %1393 = vmatprep.subr.mxu0 %v1354_v16  ;;  %v3677_v41 = vpop.f32.mrf.mxu1 }
 0x12d   : > { %1470 = vmatprep.subr.mxu1 %v1356_v19  ;;  %1394 = vmatpush1.msra.mxu0 %v1353_v12  ;;  %v3679_v42 = vpop.f32.mrf.mxu0 }
 0x12e   : > { %1471 = vmatpush1.msra.mxu1 %v1355_v15  ;;  %1395 = vmatprep.subr.mxu0 %v1346_v17  ;;  %v3681_v43 = vpop.f32.mrf.mxu1 }
 0x12f   : > { %1472 = vmatprep.subr.mxu1 %v1348_v20  ;;  %1396 = vmatpush1.msra.mxu0 %v1345_v21  ;;  %v3683_v44 = vpop.f32.mrf.mxu0 }
 0x130   : > { %1473 = vmatpush1.msra.mxu1 %v1347_v24  ;;  %1397 = vmatprep.subr.mxu0 %v1338_v27  ;;  %v3685_v45 = vpop.f32.mrf.mxu1 }
 0x131   : > { %1474 = vmatprep.subr.mxu1 %v1340_v30  ;;  %1398 = vmatpush1.msra.mxu0 %v1337_v29  ;;  %v3687_v46 = vpop.f32.mrf.mxu0 }
 0x132   : > { %1475 = vmatpush1.msra.mxu1 %v1339_v32  ;;  %1399 = vmatprep.subr.mxu0 %v1330_v31  ;;  %v3689_v47 = vpop.f32.mrf.mxu1 }
 0x133   : > { %1476 = vmatprep.subr.mxu1 %v1332_v33  ;;  %1400 = vmatpush1.msra.mxu0 %v1329_v34  ;;  %v3691_v48 = vpop.f32.mrf.mxu0 }
 0x134   : > { %1477 = vmatpush1.msra.mxu1 %v1331_v36  ;;  %2897 = vmatmul.mubr.msk.f32.vlgmr.msra.gmra.mxu0 %vm832_vm0, %v3652_v35  ;;  %v3693_v49 = vpop.f32.mrf.mxu1 }
 0x135   : > { %2899 = vmatmul.mubr.msk.f32.vlgmr.msra.gmra.mxu1 %vm832_vm0, %v3652_v35  ;;  %1439 = vmatprep.mubr.f32.mxu0 %v3282_v0  ;;  %v3695_v50 = vpop.f32.mrf.mxu0 }
 0x136   : > { %1516 = vmatprep.mubr.f32.mxu1 %v3282_v0  ;;  %v3697_v51 = vpop.f32.mrf.mxu1 }
 0x137   : > { %v3699_v53 = vpop.f32.mrf.mxu0 }
 0x138   : > { %2898 = vmatmul.mubr.msk.f32.gmra.mxu0 %vm832_vm0, %v3662_v37  ;;  %v3701_v54 = vpop.f32.mrf.mxu1 }
 0x139   : > { %2900 = vmatmul.mubr.msk.f32.gmra.mxu1 %vm832_vm0, %v3662_v37  ;;  %1587 = vmatprep.mubr.f32.mxu0 %v3282_v0 }
 0x13a   : > { %1664 = vmatprep.mubr.f32.mxu1 %v3282_v0 }
 0x159   : > { %v1217_v55 = vpop.f32.mrf.mxu0 }
 0x15a   : > { %v1290_v56 = vpop.f32.mrf.mxu1 }
 0x15b   : > { %v1219_v58 = vpop.f32.mrf.mxu0  ;;  %v1291_v31 = vadd.f32 %v1290_v56, %v3638_v10 }
 0x15c   : > { %v1292_v59 = vpop.f32.mrf.mxu1  ;;  %v1220_v25 = vadd.f32 %v1219_v58, %v3638_v10 }
 0x15d   : > { %v1221_v61 = vpop.f32.mrf.mxu0  ;;  %v1293_v29 = vadd.f32 %v1292_v59, %v3638_v10 }
 0x15e   : > { %v1294_v62 = vpop.f32.mrf.mxu1  ;;  %v1222_v21 = vadd.f32 %v1221_v61, %v3627_v57  ;;  %v1335_v61 = vmax.f32 %v1291_v31, 0.0 }
 0x15f   : > { %v1223_v63 = vpop.f32.mrf.mxu0  ;;  %v1295_v26 = vadd.f32 %v1294_v62, %v3627_v57  ;;  %v1336_v59 = vmax.f32 %v1293_v29, 0.0 }
 0x160   : > { %v1296_v1 = vpop.f32.mrf.mxu1  ;;  %v1224_v18 = vadd.f32 %v1223_v63, %v3627_v57  ;;  %v1341_v34 = vmax.f32 %v1222_v21, 0.0 }
 0x161   : > { %v1227_v2 = vpop.f32.mrf.mxu0  ;;  %v1297_v22 = vadd.f32 %v1296_v1, %v3627_v57  ;;  %v1334_v57 = vmax.f32 %v1220_v25, 0.0  ;;  %v1343_v58 = vmax.f32 %v1295_v26, 0.0 }
 0x162   : > { %v1300_v3 = vpop.f32.mrf.mxu1  ;;  %v1228_v15 = vadd.f32 %v1227_v2, %v3629_v60  ;;  %v1342_v32 = vmax.f32 %v1224_v18, 0.0 }
 0x163   : > { %v1229_v4 = vpop.f32.mrf.mxu0  ;;  %v1301_v19 = vadd.f32 %v1300_v3, %v3629_v60  ;;  %v1344_v36 = vmax.f32 %v1297_v22, 0.0 }
 0x164   : > { %v1302_v5 = vpop.f32.mrf.mxu1  ;;  %v1230_v11 = vadd.f32 %v1229_v4, %v3629_v60  ;;  %v1349_v30 = vmax.f32 %v1228_v15, 0.0  ;;  %v475_v15 = vpop.permute.xlu1 %474 }
 0x165   : > { %v1231_v6 = vpop.f32.mrf.mxu0  ;;  %v1303_v16 = vadd.f32 %v1302_v5, %v3629_v60  ;;  %v1351_v33 = vmax.f32 %v1301_v19, 0.0  ;;  %v1094_v22 = vadd.f32 %v3675_v40, %v475_v15  ;;  %v1092_v25 = vadd.f32 %v3671_v38, %v475_v15 }
 0x166   : > { %v1304_v7 = vpop.f32.mrf.mxu1  ;;  %v1232_v8 = vadd.f32 %v1231_v6, %v3625_v52  ;;  %v1350_v27 = vmax.f32 %v1230_v11, 0.0  ;;  %v1167_v26 = vadd.f32 %v3677_v41, %v475_v15 }
 0x167   : > { %v1233_v9 = vpop.f32.mrf.mxu0  ;;  %v1305_v12 = vadd.f32 %v1304_v7, %v3625_v52  ;;  %v1352_v60 = vmax.f32 %v1303_v16, 0.0 }
 0x168   : > { %v1234_v13 = vadd.f32 %v1233_v9, %v3625_v52  ;;  %v1306_v14 = vpop.f32.mrf.mxu1  ;;  %v1357_v23 = vmax.f32 %v1232_v8, 0.0 }
 0x169   : > { %v1307_v17 = vadd.f32 %v1306_v14, %v3625_v52  ;;  %v1359_v28 = vmax.f32 %v1305_v12, 0.0  ;;  %v1218_v52 = vadd.f32 %v1217_v55, %v3638_v10  ;;  %v3731_v10 = vpop.f32.mrf.mxu0 }
 0x16a   : > { %v1358_v20 = vmax.f32 %v1234_v13, 0.0  ;;  %v3733_v56 = vpop.f32.mrf.mxu1  ;;  %v480_v13 = vpop.permute.xlu0 %479 }
 0x16b   : > { %v1360_v24 = vmax.f32 %v1307_v17, 0.0  ;;  %v1333_v55 = vmax.f32 %v1218_v52, 0.0  ;;  %v3735_v62 = vpop.f32.mrf.mxu0  ;;  %v1096_v18 = vadd.f32 %v3679_v42, %v480_v13  ;;  %v1098_v21 = vadd.f32 %v3683_v44, %v480_v13 }
 0x16c   : > { %1547 = vmatprep.subr.mxu0 %v1358_v20  ;;  %v1169_v20 = vadd.f32 %v3681_v43, %v480_v13  ;;  %v1165_v52 = vadd.f32 %v3673_v39, %v475_v15  ;;  %v1709_v39 = vld [vmem:[%s3897_s4] sm:$0xff] }
 0x16d   : > { %1624 = vmatprep.subr.mxu1 %v1360_v24  ;;  %1548 = vmatpush1.msra.mxu0 %v1357_v23  ;;  %v3739_v63 = vpop.f32.mrf.mxu0  ;;  %v1171_v24 = vadd.f32 %v3685_v45, %v480_v13 }
 0x16e   : > { %1625 = vmatpush1.msra.mxu1 %v1359_v28  ;;  %1549 = vmatprep.subr.mxu0 %v1350_v27 }
 0x16f   : > { %1626 = vmatprep.subr.mxu1 %v1352_v60  ;;  %1550 = vmatpush1.msra.mxu0 %v1349_v30  ;;  %v3743_v2 = vpop.f32.mrf.mxu0 }
 0x170   : > { %1627 = vmatpush1.msra.mxu1 %v1351_v33  ;;  %1551 = vmatprep.subr.mxu0 %v1342_v32 }
 0x171   : > { %1628 = vmatprep.subr.mxu1 %v1344_v36  ;;  %1552 = vmatpush1.msra.mxu0 %v1341_v34 }
 0x172   : > { %1629 = vmatpush1.msra.mxu1 %v1343_v58  ;;  %1553 = vmatprep.subr.mxu0 %v1334_v57 }
 0x173   : > { %1630 = vmatprep.subr.mxu1 %v1336_v59  ;;  %1554 = vmatpush1.msra.mxu0 %v1333_v55 }
 0x174   : > { %1631 = vmatpush1.msra.mxu1 %v1335_v61  ;;  %2901 = vmatmul.mubr.msk.f32.vlgmr.msra.gmra.mxu0 %vm832_vm0, %v3652_v35 }
 0x175   : > { %2903 = vmatmul.mubr.msk.f32.vlgmr.msra.gmra.mxu1 %vm832_vm0, %v3652_v35  ;;  %1593 = vmatprep.mubr.f32.mxu0 %v3282_v0  ;;  %v3737_v35 = vpop.f32.mrf.mxu1 }
 0x176   : > { %1670 = vmatprep.mubr.f32.mxu1 %v3282_v0 }
 0x177   : > { %v3741_v1 = vpop.f32.mrf.mxu1 }
 0x178   : > { %2902 = vmatmul.mubr.msk.f32.gmra.mxu0 %vm832_vm0, %v3662_v37 }
 0x179   : > { %2904 = vmatmul.mubr.msk.f32.gmra.mxu1 %vm832_vm0, %v3662_v37  ;;  %1778 = vmatprep.mubr.f32.mxu0 %v3282_v0  ;;  %v3745_v3 = vpop.f32.mrf.mxu1  ;;  %v3747_v37 = vpop.f32.mrf.mxu0 }
 0x17a   : > { %1849 = vmatprep.mubr.f32.mxu1 %v3282_v0 }
 0x17b   : > { %v3749_v4 = vpop.f32.mrf.mxu1  ;;  %v3751_v5 = vpop.f32.mrf.mxu0 }
 0x17d   : > { %v3753_v6 = vpop.f32.mrf.mxu1  ;;  %v3755_v7 = vpop.f32.mrf.mxu0 }
 0x17f   : > { %v3757_v8 = vpop.f32.mrf.mxu1  ;;  %v3759_v9 = vpop.f32.mrf.mxu0 }
 0x181   : > { %v3761_v11 = vpop.f32.mrf.mxu1 }
 0x1f4   : > { %v1435_v12 = vpop.f32.mrf.mxu0 }
 0x1f5   : > { %v1512_v14 = vpop.f32.mrf.mxu1  ;;  %v1677_v43 = vadd.f32 %v1435_v12, %v1092_v25  ;;  %v1242_v12 = vadd.f32 %v3739_v63, %v480_v13  ;;  %v1311_v25 = vadd.f32 %v3733_v56, %v475_v15  ;;  %v485_v56 = vpop.permute.xlu0 %484 }
 0x1f6   : > { %v1437_v16 = vpop.f32.mrf.mxu0  ;;  %v1679_v32 = vadd.f32 %v1512_v14, %v1165_v52 }
 0x1f7   : > { %v1514_v17 = vpop.f32.mrf.mxu1  ;;  %v1678_v29 = vadd.f32 %v1437_v16, %v1094_v22  ;;  %v1693_v38 = vmax.f32 %v1677_v43, 0.0  ;;  %v1240_v16 = vadd.f32 %v3735_v62, %v475_v15  ;;  %v1317_v22 = vadd.f32 %v3745_v3, %v480_v13 }
 0x1f8   : > { %v1441_v19 = vpop.f32.mrf.mxu0  ;;  %v1680_v31 = vadd.f32 %v1514_v17, %v1167_v26  ;;  %v1695_v57 = vmax.f32 %v1679_v32, 0.0  ;;  %v1315_v17 = vadd.f32 %v3741_v1, %v480_v13 }
 0x1f9   : > { %v1518_v23 = vpop.f32.mrf.mxu1  ;;  %v1685_v27 = vadd.f32 %v1441_v19, %v1096_v18  ;;  %v1694_v45 = vmax.f32 %v1678_v29, 0.0  ;;  %v1244_v18 = vadd.f32 %v3743_v2, %v480_v13 }
 0x1fa   : > { %v1443_v28 = vpop.f32.mrf.mxu0  ;;  %v1687_v42 = vadd.f32 %v1518_v23, %v1169_v20  ;;  %v1696_v41 = vmax.f32 %v1680_v31, 0.0  ;;  %v1238_v20 = vadd.f32 %v3731_v10, %v475_v15  ;;  %v1175_v31 = vadd.f32 %v3689_v47, %v485_v56 }
 0x1fb   : > { %v1686_v30 = vadd.f32 %v1443_v28, %v1098_v21  ;;  %v1520_v60 = vpop.f32.mrf.mxu1  ;;  %v1701_v33 = vmax.f32 %v1685_v27, 0.0  ;;  %v1313_v21 = vadd.f32 %v3737_v35, %v475_v15  ;;  %v1102_v15 = vadd.f32 %v3687_v46, %v485_v56  ;;  %v2014_v46 = vld [vmem:[%s3898_s5] sm:$0xff] }
 0x1fc   : > { %v1688_v44 = vadd.f32 %v1520_v60, %v1171_v24  ;;  %v1703_v36 = vmax.f32 %v1687_v42, 0.0 }
 0x1fd   : > { %v1702_v40 = vmax.f32 %v1686_v30, 0.0 }
 0x1fe   : > { %v1704_v34 = vmax.f32 %v1688_v44, 0.0  ;;  %v1104_v44 = vadd.f32 %v3691_v48, %v485_v56  ;;  %v1248_v48 = vadd.f32 %v3747_v37, %v485_v56  ;;  %v490_v37 = vpop.permute.xlu1 %489 }
 0x1ff   : > { %1742 = vmatprep.subr.mxu0 %v1702_v40  ;;  %v1177_v40 = vadd.f32 %v3693_v49, %v485_v56 }
 0x200   : > { %1813 = vmatprep.subr.mxu1 %v1704_v34  ;;  %1743 = vmatpush1.msra.mxu0 %v1701_v33 }
 0x201   : > { %1814 = vmatpush1.msra.mxu1 %v1703_v36  ;;  %1744 = vmatprep.subr.mxu0 %v1694_v45 }
 0x202   : > { %1815 = vmatprep.subr.mxu1 %v1696_v41  ;;  %1745 = vmatpush1.msra.mxu0 %v1693_v38 }
 0x203   : > { %1816 = vmatpush1.msra.mxu1 %v1695_v57  ;;  %2905 = vmatmul.mubr.msk.f32.vlgmr.msra.gmra.mxu0 %vm1710_vm1, %v1709_v39 }
 0x204   : > { %2906 = vmatmul.mubr.msk.f32.vlgmr.msra.gmra.mxu1 %vm1710_vm1, %v1709_v39  ;;  %1920 = vmatprep.mubr.f32.mxu0 %v3282_v0 }
 0x205   : > { %1991 = vmatprep.mubr.f32.mxu1 %v3282_v0 }
 0x234   : > { %v1589_v58 = vpop.f32.mrf.mxu0 }
 0x235   : > { %v1666_v55 = vpop.f32.mrf.mxu1  ;;  %v1681_v62 = vadd.f32 %v1589_v58, %v1238_v20 }
 0x236   : > { %v1591_v59 = vpop.f32.mrf.mxu0  ;;  %v1683_v29 = vadd.f32 %v1666_v55, %v1311_v25  ;;  %v1321_v55 = vadd.f32 %v3749_v4, %v485_v56  ;;  %v1106_v4 = vadd.f32 %v3695_v50, %v490_v37  ;;  %v1179_v25 = vadd.f32 %v3697_v51, %v490_v37  ;;  %v2319_v50 = vld [vmem:[%s3899_s6] sm:$0x3] }
 0x237   : > { %v1668_v61 = vpop.f32.mrf.mxu1  ;;  %v1682_v26 = vadd.f32 %v1591_v59, %v1240_v16  ;;  %v1697_v35 = vmax.f32 %v1681_v62, 0.0  ;;  %v1250_v59 = vadd.f32 %v3751_v5, %v485_v56  ;;  %v1252_v51 = vadd.f32 %v3755_v7, %v490_v37  ;;  %v3826_v7 = vpop.permute.xlu0 %2323 }
 0x238   : > { %v1595_v14 = vpop.f32.mrf.mxu0  ;;  %v1684_v52 = vadd.f32 %v1668_v61, %v1313_v21  ;;  %v1699_v13 = vmax.f32 %v1683_v29, 0.0 }
 0x239   : > { %v1672_v19 = vpop.f32.mrf.mxu1  ;;  %v1689_v23 = vadd.f32 %v1595_v14, %v1242_v12  ;;  %v1698_v10 = vmax.f32 %v1682_v26, 0.0  ;;  %v1323_v12 = vadd.f32 %v3753_v6, %v485_v56  ;;  %v1108_v6 = vadd.f32 %v3699_v53, %v490_v37 }
 0x23a   : > { %v1597_v24 = vpop.f32.mrf.mxu0  ;;  %v1691_v63 = vadd.f32 %v1672_v19, %v1315_v17  ;;  %v1700_v3 = vmax.f32 %v1684_v52, 0.0 }
 0x23b   : > { %v1690_v27 = vadd.f32 %v1597_v24, %v1244_v18  ;;  %v1674_v28 = vpop.f32.mrf.mxu1  ;;  %v1705_v42 = vmax.f32 %v1689_v23, 0.0 }
 0x23c   : > { %v1692_v1 = vadd.f32 %v1674_v28, %v1317_v22  ;;  %v1707_v60 = vmax.f32 %v1691_v63, 0.0  ;;  %v1181_v63 = vadd.f32 %v3701_v54, %v490_v37  ;;  %v1325_v54 = vadd.f32 %v3757_v8, %v490_v37 }
 0x23d   : > { %v1706_v2 = vmax.f32 %v1690_v27, 0.0 }
 0x23e   : > { %v1708_v30 = vmax.f32 %v1692_v1, 0.0 }
 0x23f   : > { %1884 = vmatprep.subr.mxu0 %v1706_v2 }
 0x240   : > { %1955 = vmatprep.subr.mxu1 %v1708_v30  ;;  %1885 = vmatpush1.msra.mxu0 %v1705_v42 }
 0x241   : > { %1956 = vmatpush1.msra.mxu1 %v1707_v60  ;;  %1886 = vmatprep.subr.mxu0 %v1698_v10  ;;  %v1254_v60 = vadd.f32 %v3759_v9, %v490_v37 }
 0x242   : > { %1957 = vmatprep.subr.mxu1 %v1700_v3  ;;  %1887 = vmatpush1.msra.mxu0 %v1697_v35  ;;  %v1327_v3 = vadd.f32 %v3761_v11, %v490_v37 }
 0x243   : > { %1958 = vmatpush1.msra.mxu1 %v1699_v13  ;;  %2907 = vmatmul.mubr.msk.f32.vlgmr.msra.gmra.mxu0 %vm1710_vm1, %v1709_v39 }
 0x244   : > { %2908 = vmatmul.mubr.msk.f32.vlgmr.msra.gmra.mxu1 %vm1710_vm1, %v1709_v39  ;;  %2083 = vmatprep.mubr.f32.mxu0 %v3282_v0 }
 0x245   : > { %2154 = vmatprep.mubr.f32.mxu1 %v3282_v0 }
 0x2c3   : > { %v1780_v43 = vpop.f32.mrf.mxu0 }
 0x2c4   : > { %v1851_v32 = vpop.f32.mrf.mxu1  ;;  %v1998_v33 = vadd.f32 %v1780_v43, %v1102_v15 }
 0x2c5   : > { %v1782_v34 = vpop.f32.mrf.mxu0  ;;  %v2000_v45 = vadd.f32 %v1851_v32, %v1175_v31 }
 0x2c6   : > { %v1999_v36 = vadd.f32 %v1782_v34, %v1104_v44  ;;  %v1853_v38 = vpop.f32.mrf.mxu1  ;;  %v2006_v57 = vmax.f32 %v1998_v33, 0.0 }
 0x2c7   : > { %v2001_v41 = vadd.f32 %v1853_v38, %v1177_v40  ;;  %v2008_v47 = vmax.f32 %v2000_v45, 0.0 }
 0x2c8   : > { %v2007_v39 = vmax.f32 %v1999_v36, 0.0 }
 0x2c9   : > { %v2009_v58 = vmax.f32 %v2001_v41, 0.0 }
 0x2ca   : > { %2049 = vmatprep.subr.mxu0 %v2007_v39 }
 0x2cb   : > { %2120 = vmatprep.subr.mxu1 %v2009_v58  ;;  %2050 = vmatpush1.msra.mxu0 %v2006_v57 }
 0x2cc   : > { %2121 = vmatpush1.msra.mxu1 %v2008_v47  ;;  %2909 = vmatmul.mubr.msk.f32.vlgmr.msra.gmra.mxu0 %vm2015_vm2, %v2014_v46 }
 0x2cd   : > { %2910 = vmatmul.mubr.msk.f32.vlgmr.msra.gmra.mxu1 %vm2015_vm2, %v2014_v46  ;;  %2225 = vmatprep.mubr.f32.mxu0 %v3282_v0 }
 0x2ce   : > { %2296 = vmatprep.mubr.f32.mxu1 %v3282_v0 }
 0x303   : > { %v1922_v49 = vpop.f32.mrf.mxu0 }
 0x304   : > { %v1993_v61 = vpop.f32.mrf.mxu1  ;;  %v2002_v14 = vadd.f32 %v1922_v49, %v1248_v48 }
 0x305   : > { %v1924_v16 = vpop.f32.mrf.mxu0  ;;  %v2004_v17 = vadd.f32 %v1993_v61, %v1321_v55 }
 0x306   : > { %v2003_v18 = vadd.f32 %v1924_v16, %v1250_v59  ;;  %v1995_v19 = vpop.f32.mrf.mxu1  ;;  %v2010_v22 = vmax.f32 %v2002_v14, 0.0  ;;  %v3283_v16 = vmov 1983009808  }
 0x307   : > { %v2005_v20 = vadd.f32 %v1995_v19, %v1323_v12  ;;  %v2012_v24 = vmax.f32 %v2004_v17, 0.0  ;;  %v2697_v17 = vunpack.c.l.s4 %v3283_v16 }
 0x308   : > { %v2011_v21 = vmax.f32 %v2003_v18, 0.0  ;;  %v2699_v18 = vlaneseq }
 0x309   : > { %v2013_v23 = vmax.f32 %v2005_v20, 0.0 }
 0x30a   : > { %2191 = vmatprep.subr.mxu0 %v2011_v21 }
 0x30b   : > { %2262 = vmatprep.subr.mxu1 %v2013_v23  ;;  %2192 = vmatpush1.msra.mxu0 %v2010_v22  ;;  %v2698_v22 = vunpack.c.0.s8 %v2697_v17  ;;  %v2700_v23 = vshrl.u32 %v2699_v18, 7 }
 0x30c   : > { %2263 = vmatpush1.msra.mxu1 %v2012_v24  ;;  %2911 = vmatmul.mubr.msk.f32.vlgmr.msra.gmra.mxu0 %vm2015_vm2, %v2014_v46 }
 0x30d   : > { %2912 = vmatmul.mubr.msk.f32.vlgmr.msra.gmra.mxu1 %vm2015_vm2, %v2014_v46  ;;  %2393 = vmatprep.mubr.f32.mxu0 %v3282_v0 }
 0x30e   : > { %2464 = vmatprep.mubr.f32.mxu1 %v3282_v0 }
 0x38c   : > { %v2085_v5 = vpop.f32.mrf.mxu0 }
 0x38d   : > { %v2156_v26 = vpop.f32.mrf.mxu1  ;;  %v2303_v27 = vadd.f32 %v2085_v5, %v1106_v4 }
 0x38e   : > { %v2087_v28 = vpop.f32.mrf.mxu0  ;;  %v2305_v62 = vadd.f32 %v2156_v26, %v1179_v25  ;;  %v3832_v26 = vsub.s32 %v2698_v22, %v2700_v23 }
 0x38f   : > { %v2304_v52 = vadd.f32 %v2087_v28, %v1108_v6  ;;  %v2158_v1 = vpop.f32.mrf.mxu1  ;;  %v2311_v42 = vmax.f32 %v2303_v27, 0.0 }
 0x390   : > { %v2306_v29 = vadd.f32 %v2158_v1, %v1181_v63  ;;  %v2313_v10 = vmax.f32 %v2305_v62, 0.0 }
 0x391   : > { %v2312_v2 = vmax.f32 %v2304_v52, 0.0 }
 0x392   : > { %v2314_v30 = vmax.f32 %v2306_v29, 0.0 }
 0x393   : > { %2359 = vmatprep.subr.mxu0 %v2312_v2 }
 0x394   : > { %2430 = vmatprep.subr.mxu1 %v2314_v30  ;;  %2360 = vmatpush1.msra.mxu0 %v2311_v42 }
 0x395   : > { %2431 = vmatpush1.msra.mxu1 %v2313_v10  ;;  %2913 = vmatmul.mubr.msk.f32.vlgmr.msra.gmra.mxu0 %vm2015_vm2, %v2319_v50 }
 0x396   : > { %2914 = vmatmul.mubr.msk.f32.vlgmr.msra.gmra.mxu1 %vm2015_vm2, %v2319_v50  ;;  %2535 = vmatprep.mubr.f32.mxu0 %v3282_v0 }
 0x397   : > { %2606 = vmatprep.mubr.f32.mxu1 %v3282_v0 }
 0x3cc   : > { %v2227_v53 = vpop.f32.mrf.mxu0 }
 0x3cd   : > { %v2298_v35 = vpop.f32.mrf.mxu1  ;;  %v2307_v13 = vadd.f32 %v2227_v53, %v1252_v51 }
 0x3ce   : > { %v2229_v56 = vpop.f32.mrf.mxu0  ;;  %v2309_v15 = vadd.f32 %v2298_v35, %v1325_v54 }
 0x3cf   : > { %v2308_v43 = vadd.f32 %v2229_v56, %v1254_v60  ;;  %v2300_v31 = vpop.f32.mrf.mxu1  ;;  %v2315_v40 = vmax.f32 %v2307_v13, 0.0 }
 0x3d0   : > { %v2310_v44 = vadd.f32 %v2300_v31, %v1327_v3  ;;  %v2317_v0 = vmax.f32 %v2309_v15, 0.0 }
 0x3d1   : > { %v2316_v32 = vmax.f32 %v2308_v43, 0.0 }
 0x3d2   : > { %v2318_v33 = vmax.f32 %v2310_v44, 0.0 }
 0x3d3   : > { %2501 = vmatprep.subr.mxu0 %v2316_v32 }
 0x3d4   : > { %2572 = vmatprep.subr.mxu1 %v2318_v33  ;;  %2502 = vmatpush1.msra.mxu0 %v2315_v40 }
 0x3d5   : > { %2573 = vmatpush1.msra.mxu1 %v2317_v0  ;;  %2915 = vmatmul.mubr.msk.f32.vlgmr.msra.gmra.mxu0 %vm2015_vm2, %v2319_v50 }
 0x3d6   : > { %2916 = vmatmul.mubr.msk.f32.vlgmr.msra.gmra.mxu1 %vm2015_vm2, %v2319_v50 }
 0x455   : > { %v2395_v8 = vpop.f32.mrf.mxu0 }
 0x456   : > { %v2396_v9 = vadd.f32 %v2395_v8, %v3826_v7  ;;  %v2466_v11 = vpop.f32.mrf.mxu1 }
 0x457   : > { %v2467_v34 = vadd.f32 %v2466_v11, %v3826_v7  ;;  %v2397_v45 = vpop.f32.mrf.mxu0 }
 0x458   : > { %v2917_v36 = vmul.f32 -1.442695, %v2396_v9  ;;  %v2398_v38 = vadd.f32 %v2397_v45, %v3826_v7  ;;  %v2468_v41 = vpop.f32.mrf.mxu1 }
 0x459   : > { %v2919_v39 = vmul.f32 -1.442695, %v2467_v34  ;;  %v2469_v57 = vadd.f32 %v2468_v41, %v3826_v7 }
 0x45a   : > { %3171 = vpow2.f32 %v2917_v36  ;;  %v2918_v58 = vmul.f32 -1.442695, %v2398_v38 }
 0x45b   : > { %3173 = vpow2.f32 %v2919_v39  ;;  %v2920_v46 = vmul.f32 -1.442695, %v2469_v57 }
 0x45c   : > { %3175 = vpow2.f32 %v2918_v58 }
 0x45d   : > { %3177 = vpow2.f32 %v2920_v46 }
 0x45e   : > { %3179 = vtanh.f32 %v2396_v9 }
 0x45f   : > { %3181 = vtanh.f32 %v2467_v34 }
 0x460   : > { %3183 = vtanh.f32 %v2398_v38 }
 0x461   : > { %3185 = vtanh.f32 %v2469_v57 }
 0x467   : > { %v3172_v47 = vpop.eup %3171 }
 0x468   : > { %v3174_v48 = vpop.eup %3173  ;;  %v2653_v49 = vadd.f32 1.0, %v3172_v47 }
 0x469   : > { %v2655_v55 = vadd.f32 1.0, %v3174_v48  ;;  %v3176_v59 = vpop.eup %3175 }
 0x46a   : > { %3187 = vrcp.f32 %v2653_v49  ;;  %v2654_v61 = vadd.f32 1.0, %v3176_v59  ;;  %v3178_v12 = vpop.eup %3177 }
 0x46b   : > { %3189 = vrcp.f32 %v2655_v55  ;;  %v2656_v14 = vadd.f32 1.0, %v3178_v12  ;;  %v3180_v19 = vpop.eup %3179 }
 0x46c   : > { %3191 = vrcp.f32 %v2654_v61  ;;  %v3182_v20 = vpop.eup %3181  ;;  %v2621_v5 = vmul.f32 0.5, %v3180_v19 }
 0x46d   : > { %3193 = vrcp.f32 %v2656_v14  ;;  %v3184_v21 = vpop.eup %3183  ;;  %v2623_v27 = vmul.f32 0.5, %v3182_v20 }
 0x46e   : > { %v3186_v24 = vpop.eup %3185  ;;  %v2622_v6 = vmul.f32 0.5, %v3184_v21 }
 0x46f   : > { %v2624_v62 = vmul.f32 0.5, %v3186_v24 }
 0x477   : > { %v3188_v37 = vpop.eup %3187 }
 0x478   : > { %v3190_v4 = vpop.eup %3189  ;;  %v2678_v63 = vsel %vm2677_vm3, %v2621_v5, %v3188_v37 }
 0x479   : > { %v3192_v25 = vpop.eup %3191  ;;  %v2680_v29 = vsel %vm2677_vm3, %v2623_v27, %v3190_v4 }
 0x47a   : > { %v2679_v28 = vsel %vm2677_vm3, %v2622_v6, %v3192_v25  ;;  %v3194_v52 = vpop.eup %3193 }
 0x47b   : > { %v2694_v1 = vcombine.low %v2678_v63, %v2679_v28  ;;  %v2681_v2 = vsel %vm2677_vm3, %v2624_v62, %v3194_v52 }
 0x47c   : > { %v2695_v42 = vcombine.low %v2680_v29, %v2681_v2 }
 0x47d   : > { %v2702_v30 = vrot.slane %v2694_v1, %v3832_v26 }
 0x47e   : > { %v2709_v50 = vrot.slane %v2695_v42, %v3832_v26 }
 0x480   : > { %v2710_v10 = vcombine.low %v2702_v30, %v2709_v50 }
 0x482   : > { %2730 = vst [vmem:[%s3843_s22] sm:$0xff] %v2710_v10 }
 0x495   : > { %v2537_v51 = vpop.f32.mrf.mxu0 }
 0x496   : > { %v2538_v53 = vadd.f32 %v2537_v51, %v3826_v7  ;;  %v2608_v54 = vpop.f32.mrf.mxu1 }
 0x497   : > { %v2609_v60 = vadd.f32 %v2608_v54, %v3826_v7  ;;  %v2539_v35 = vpop.f32.mrf.mxu0 }
 0x498   : > { %v2921_v3 = vmul.f32 -1.442695, %v2538_v53  ;;  %v2540_v13 = vadd.f32 %v2539_v35, %v3826_v7  ;;  %v2610_v56 = vpop.f32.mrf.mxu1 }
 0x499   : > { %v2923_v15 = vmul.f32 -1.442695, %v2609_v60  ;;  %v2611_v43 = vadd.f32 %v2610_v56, %v3826_v7 }
 0x49a   : > { %3195 = vpow2.f32 %v2921_v3  ;;  %v2922_v31 = vmul.f32 -1.442695, %v2540_v13 }
 0x49b   : > { %3197 = vpow2.f32 %v2923_v15  ;;  %v2924_v44 = vmul.f32 -1.442695, %v2611_v43 }
 0x49c   : > { %3199 = vpow2.f32 %v2922_v31 }
 0x49d   : > { %3201 = vpow2.f32 %v2924_v44 }
 0x49e   : > { %3203 = vtanh.f32 %v2538_v53 }
 0x49f   : > { %3205 = vtanh.f32 %v2609_v60 }
 0x4a0   : > { %3207 = vtanh.f32 %v2540_v13 }
 0x4a1   : > { %3209 = vtanh.f32 %v2611_v43 }
 0x4a7   : > { %v3196_v32 = vpop.eup %3195 }
 0x4a8   : > { %v3198_v40 = vpop.eup %3197  ;;  %v2657_v33 = vadd.f32 1.0, %v3196_v32 }
 0x4a9   : > { %v2659_v0 = vadd.f32 1.0, %v3198_v40  ;;  %v3200_v8 = vpop.eup %3199 }
 0x4aa   : > { %3211 = vrcp.f32 %v2657_v33  ;;  %v2658_v9 = vadd.f32 1.0, %v3200_v8  ;;  %v3202_v11 = vpop.eup %3201 }
 0x4ab   : > { %3213 = vrcp.f32 %v2659_v0  ;;  %v2660_v7 = vadd.f32 1.0, %v3202_v11  ;;  %v3204_v34 = vpop.eup %3203 }
 0x4ac   : > { %3215 = vrcp.f32 %v2658_v9  ;;  %v3206_v45 = vpop.eup %3205  ;;  %v2625_v41 = vmul.f32 0.5, %v3204_v34 }
 0x4ad   : > { %3217 = vrcp.f32 %v2660_v7  ;;  %v3208_v36 = vpop.eup %3207  ;;  %v2627_v57 = vmul.f32 0.5, %v3206_v45 }
 0x4ae   : > { %v3210_v38 = vpop.eup %3209  ;;  %v2626_v48 = vmul.f32 0.5, %v3208_v36 }
 0x4af   : > { %v2628_v59 = vmul.f32 0.5, %v3210_v38 }
 0x4b7   : > { %v3212_v39 = vpop.eup %3211 }
 0x4b8   : > { %v3214_v58 = vpop.eup %3213  ;;  %v2682_v46 = vsel %vm2677_vm3, %v2625_v41, %v3212_v39 }
 0x4b9   : > { %v2684_v47 = vsel %vm2677_vm3, %v2627_v57, %v3214_v58  ;;  %v3216_v49 = vpop.eup %3215 }
 0x4ba   : > { %v2683_v55 = vsel %vm2677_vm3, %v2626_v48, %v3216_v49  ;;  %v3218_v61 = vpop.eup %3217 }
 0x4bb   : > { %v2711_v12 = vcombine.low %v2682_v46, %v2683_v55  ;;  %v2685_v14 = vsel %vm2677_vm3, %v2628_v59, %v3218_v61 }
 0x4bc   : > { %v2712_v16 = vcombine.low %v2684_v47, %v2685_v14 }
 0x4bd   : > { %v2719_v17 = vrot.slane %v2711_v12, %v3832_v26 }
 0x4be   : > { %v2726_v18 = vrot.slane %v2712_v16, %v3832_v26 }
 0x4c0   : > { %v2727_v19 = vcombine.low %v2719_v17, %v2726_v18 }
 0x4c2   : > { %2731 = vst [vmem:[%s3843_s22 + $0x8] sm:$0xff] %v2727_v19 }
 0x4c3   : > { %3232 = shalt.err (!%p3229_p3)
}
 0x4c4   : > { %s3233_s19 = scalar_lea.hbm %s2745_s10, 256  ;;  %s3237_s22 = scalar_lea.hbm %s3901_s8, 1024 }
 0x4c5   : > { %p3234_p4 = scmp.ne.s32.totalorder %s2745_s10, %s3233_s19  ;;  %p3238_p9 = scmp.lt.s32.totalorder %s2745_s10, %s3901_s8 }
 0x4c6   : > { %p3239_p10 = scmp.lt.s32.totalorder %s3237_s22, %s3233_s19 }
 0x4c7   : > { %p3235_p7 = pnand %p3234_p4, %p3368_p5 }
 0x4c8   : > { %p3240_p11 = por %p3239_p10, %p3238_p9 }
 0x4c9   : > { %p3236_p8 = pneg %p3235_p7 }
 0x4cb   : > { %p3241_p12 = pnand %p3240_p11, %p3236_p8 }
 0x4cd   : > { %3244 = shalt.err (!%p3241_p12)
}
 0x4ce   : > { %3059 = dma.vmem_to_hbm [thread:$0]  (%p3368_p5), %s2748_s24, 256, %s2745_s10, %s2733_s12  }
 0x4cf PF: > { %p3065_p13 = scmp.ge.s32.totalorder %s3279_s30, 2  ;;  %s2759_s26 = sand.u32 1, %s3267_s27  }
 0x4d0   : > { %s2760_s13 = scalar_lea.sflag [#allocation3], %s2759_s26 }
 0x4d1   : > { %p3062_p0 = pnand %p3065_p13, %p3372_p6 }
 0x4d3   : > { %p3063_p1 = pneg %p3062_p0 }
 0x4d5   : > { %3262 = dma.done.wait (%p3063_p1), %s2760_s13, 256  }
 0x4d6   : > { %3264 = vsyncadd (%p3063_p1), %s2760_s13, 4294967040  ;;  %p18_p2 = scmp.ge.s32.totalorder %s3355_s11, 6   ;;  %s3904_s27 = smov %s3271_s28 }
 0x4d7   : > { %s3905_s28 = smov %s3275_s29  ;;  %s3906_s29 = smov %s3366_s14 }
 0x4d8   : > { %s3907_s30 = smov %s3355_s11  ;;  %20 = sbr.rel (!%p18_p2) target bundleno = 3 (0x3), region = 87 }
 0x4dd   :  { %2765 = vsyncpa [#allocation3], 1 }
 0x4de   :  { %2767 = vsyncpa [#allocation3 + $0x1], 1 }

</bundles_post_ra>
